<compile_context>
chip_gen: v7x
topology: tpu7x:2x2x1
jax: 0.10.0
libtpu: 0.0.40
codegen_flags: <defaults>
</compile_context>

<pallas_src>
import math
from functools import partial

import jax
import jax.numpy as jnp
from jax import lax
from jax.experimental import pallas as pl
from jax.experimental.pallas import tpu as pltpu

EPS = 1e-8
LN_EPS = 1e-5  # nn.LayerNorm default  # TODO(synk): confirm DihedralFeatures' norm eps


def _round_up(x, m):
    return ((x + m - 1) // m) * m


# ---------------- geometry helpers (plain-JAX glue, small elementwise ops) -------------
def _norm(x, axis=-1, keepdims=True):
    return jnp.sqrt(jnp.maximum(jnp.sum(x * x, axis=axis, keepdims=keepdims), EPS))


def _normalize(x, axis=-1):
    return jnp.nan_to_num(x / _norm(x, axis=axis))


def nan_to_num(x):
    return jnp.where(jnp.isfinite(x), x, 0.0)


def get_rotation_frames(coords):
    # coords: [B, L, 3, 3]  atoms (N, CA, C) -> Gram-Schmidt local frames [B, L, 3, 3]
    v1 = coords[:, :, 2] - coords[:, :, 1]
    v2 = coords[:, :, 0] - coords[:, :, 1]
    e1 = _normalize(v1)
    u2 = v2 - e1 * jnp.sum(e1 * v2, axis=-1, keepdims=True)
    e2 = _normalize(u2)
    e3 = jnp.cross(e1, e2)
    return jnp.stack([e1, e2, e3], axis=-2)


def rotate(v, R):
    # v: [..., n, 3], R: [..., 3, 3];  out[..., n, k] = sum_j v[..., n, j] * R[..., j, k]
    return jnp.einsum('...nj,...jk->...nk', v, R)


def dihedral_features(X, eps=1e-7):
    # X: [B, L, 3, 3] backbone -> sin/cos of (phi, psi, omega) : [B, L, 6]
    B, L = X.shape[:2]
    Xf = X[:, :, :3].reshape(B, 3 * L, 3)
    dX = Xf[:, 1:] - Xf[:, :-1]
    U = _normalize(dX)
    u_2, u_1, u_0 = U[:, :-2], U[:, 1:-1], U[:, 2:]
    n_2 = _normalize(jnp.cross(u_2, u_1))
    n_1 = _normalize(jnp.cross(u_1, u_0))
    cosD = jnp.clip(jnp.sum(n_2 * n_1, -1), -1.0 + eps, 1.0 - eps)
    D = jnp.sign(jnp.sum(u_2 * n_1, -1)) * jnp.arccos(cosD)
    D = jnp.pad(D, ((0, 0), (1, 2)))
    D = D.reshape(B, L, 3)
    return jnp.concatenate([jnp.cos(D), jnp.sin(D)], axis=-1)


def orientation_features(X_ca):
    # [B, L, 3] CA coords -> forward / backward unit vectors [B, L, 2, 3]
    fwd = _normalize(X_ca[:, 1:] - X_ca[:, :-1])
    bwd = _normalize(X_ca[:, :-1] - X_ca[:, 1:])
    fwd = jnp.pad(fwd, ((0, 0), (0, 1), (0, 0)))
    bwd = jnp.pad(bwd, ((0, 0), (1, 0), (0, 0)))
    return jnp.concatenate([fwd[:, :, None], bwd[:, :, None]], axis=-2)


def sidechain_features(coords):
    # imputed C-beta direction, [B, L, 3]
    n, origin, c = coords[:, :, 0], coords[:, :, 1], coords[:, :, 2]
    c = _normalize(c - origin)
    n = _normalize(n - origin)
    bisector = _normalize(c + n)
    perp = _normalize(jnp.cross(c, n))
    return -bisector * math.sqrt(1.0 / 3.0) - perp * math.sqrt(2.0 / 3.0)


def get_node_features(coords):
    # GVPInputFeaturizer.get_node_features (with_coord_mask=False, all_atom=False)
    scalar = dihedral_features(coords)                                             # [B, L, 6]
    vec = jnp.concatenate([orientation_features(coords[:, :, 1]),
                           sidechain_features(coords)[:, :, None]], axis=-2)       # [B, L, 3, 3]
    return scalar, vec


# ---------------- fused per-token embedding kernel (the hot path) ----------------------
def fused_embed_kernel(slab_ref, w_ref, ln_g_ref, ln_b_ref, out_ref,
                       *, d_pad, d_true, ln_eps):
    x = slab_ref[...]                                      # [TM, K_pad] bf16 slab
    # single block-diagonal MXU matmul -> [fused | dih_preLN]; biases ride the ones column
    y = jnp.dot(x, w_ref[...], preferred_element_type=jnp.float32)   # [TM, 2*D_pad] f32
    fused = y[:, :d_pad]                                   # tile-aligned (d_pad % 128 == 0)
    dih = y[:, d_pad:]
    # LayerNorm (nn.LayerNorm semantics: biased var) over the TRUE D columns only.
    if d_true == d_pad:
        mu = jnp.mean(dih, axis=-1, keepdims=True)
        cent = dih - mu
        var = jnp.mean(cent * cent, axis=-1, keepdims=True)
    else:
        # padded dih columns are exactly zero (zero weight cols / zero bias), so the plain
        # sum gives the true-D sum; mask the centered term for the variance.
        inv_d = 1.0 / d_true
        mu = jnp.sum(dih, axis=-1, keepdims=True) * inv_d
        col = lax.broadcasted_iota(jnp.int32, dih.shape, 1)
        cent = jnp.where(col < d_true, dih - mu, 0.0)
        var = jnp.sum(cent * cent, axis=-1, keepdims=True) * inv_d
    # padded gain/bias columns are zero -> padded output columns stay zero
    dih_norm = (dih - mu) * lax.rsqrt(var + ln_eps) * ln_g_ref[...] + ln_b_ref[...]
    out_ref[...] = (fused + dih_norm).astype(out_ref.dtype)


# ---------------- module wrapper --------------------------------------------------------
def gvp_structure_embedding(params, batch, condition_mask, cfg):
    D = cfg['embed_dim']
    dtype = batch['gt_backbone_pos'].dtype
    embed_scale = math.sqrt(D)

    condition_mask_f = condition_mask.astype(jnp.float32)
    backbone_coords = (batch['gt_backbone_pos'][..., :3, :].astype(jnp.float32)
                       * condition_mask_f[..., None, None])
    B, L = backbone_coords.shape[:2]

    R = get_rotation_frames(backbone_coords)
    coord_mask = jnp.all(jnp.all(jnp.isfinite(backbone_coords), axis=-1), axis=-1)
    coord_mask = jnp.logical_and(coord_mask, condition_mask.astype(bool))
    coords = nan_to_num(backbone_coords)

    # node input featurizer (feeds both the GVP encoder and the input-feature embedding)
    scalar_feats, vector_feats = get_node_features(coords)       # [B,L,6], [B,L,3,3]

    # TODO(synk): full GVPEncoder (KNN graph construction + GVPConvLayer message passing)
    # has no provided source; stand-in is a deterministic per-node GVP-style projection.
    cm = coord_mask.astype(jnp.float32)
    gvp_out_scalars = jnp.einsum('blf,fh->blh', scalar_feats, params['gvp_ws']) * cm[..., None]
    gvp_out_vectors = (jnp.einsum('blcd,ch->blhd', vector_feats, params['gvp_wv'])
                       * cm[..., None, None])
    V_h = gvp_out_vectors.shape[-2]

    # single R^T rotation for both the node-feature vectors and the gvp-output vectors
    R_T = jnp.swapaxes(R, -1, -2)
    all_vec = jnp.concatenate([vector_feats, gvp_out_vectors], axis=-2)   # [B,L,3+V_h,3]
    all_vec_rot = rotate(all_vec, R_T)
    vec_rot = all_vec_rot[:, :, :3].reshape(B, L, 9)
    gvp_vec_rot = all_vec_rot[:, :, 3:].reshape(B, L, 3 * V_h)

    features = jnp.concatenate([scalar_feats, vec_rot], axis=-1)                  # [B,L,15]
    gvp_out_features = jnp.concatenate([gvp_out_scalars, gvp_vec_rot], axis=-1)   # [B,L,G]

    # NOTE: reference computes embed_dihedrals on the (not nan_to_num'd) backbone_coords.
    dih_feats = dihedral_features(backbone_coords)                                # [B,L,6]

    N = B * L
    F_in = features.shape[-1]
    G = gvp_out_features.shape[-1]
    D_dih = dih_feats.shape[-1]

    # packed bf16 slab columns: [feat*mask | gvp_out | mask | dihedrals | ones | 0-pad]
    k_fused = F_in + G + 1
    k_rows = k_fused + D_dih + 1
    K_pad = _round_up(k_rows, 64)                 # 128-byte bf16 rows
    D_pad = max(128, _round_up(D, 128))           # lane-dense output columns

    feat_masked = (features * condition_mask_f[..., None]).reshape(N, F_in)
    slab = jnp.concatenate(
        [feat_masked,
         gvp_out_features.reshape(N, G),
         condition_mask_f.reshape(N, 1),
         dih_feats.reshape(N, D_dih),
         jnp.ones((N, 1), jnp.float32)], axis=-1)
    slab = jnp.pad(slab, ((0, 0), (0, K_pad - k_rows))).astype(jnp.bfloat16)

    # block-diagonal stacked weight [K_pad, 2*D_pad]:
    #   rows feat|gvp|mask -> [ w_feat ; w_gvp ; emb[0]*sqrt(D) | 0      ]
    #   rows dihedrals     -> [ 0                               | w_dih  ]
    #   row  ones          -> [ b_feat + b_gvp                  | b_dih  ]   (bias fold, bf16)
    def pad_cols(w):
        return jnp.pad(w, ((0, 0), (0, D_pad - D))) if D_pad != D else w

    # aatype_embed=False path => aatype == 0 everywhere, so the token component is
    # condition_mask * (aatype_embedding[0] * sqrt(D)); folded in via the mask column.
    tok_row = params['aatype_embedding'][0:1] * embed_scale                       # [1, D]
    w_left = pad_cols(jnp.concatenate([params['w_feat'], params['w_gvp'], tok_row], axis=0))
    w_right = pad_cols(params['w_dih'])
    b_left = pad_cols(params['b_feat'] + params['b_gvp'])
    b_right = pad_cols(params['b_dih'])

    w_stacked = jnp.concatenate([
        jnp.concatenate([w_left, jnp.zeros((k_fused, D_pad), jnp.float32)], axis=1),
        jnp.concatenate([jnp.zeros((D_dih, D_pad), jnp.float32), w_right], axis=1),
        jnp.concatenate([b_left, b_right], axis=1),
    ], axis=0)
    w_stacked = jnp.pad(w_stacked, ((0, K_pad - k_rows), (0, 0))).astype(jnp.bfloat16)

    ln_g = pad_cols(params['ln_g']).astype(jnp.float32)
    ln_b = pad_cols(params['ln_b']).astype(jnp.float32)

    # --- tiling: >=2 grid steps when N allows (v7x has 2 TCs), tile shrunk under an explicit
    # VMEM budget derived from this chip's capacity (v6e 128 MiB, v7x 64 MiB, v5e 128 MiB).
    out_itemsize = jnp.dtype(dtype).itemsize
    try:
        vmem_cap = int(pltpu.get_tpu_info().vmem_capacity_bytes)
    except Exception:
        vmem_cap = 64 << 20
    tile_budget = max(16 << 20, vmem_cap // 3)

    def tile_vmem_bytes(tm):
        slab_b = tm * K_pad * 2                    # bf16 slab tile
        out_b = tm * D_pad * out_itemsize          # output tile
        interm = tm * (2 * D_pad) * 4 * 3          # f32 matmul result + LN temporaries
        return 2 * slab_b + 2 * out_b + interm     # double-buffered in/out + temporaries

    TM = min(1024, _round_up(max(-(-N // 2), 16), 16))
    while TM > 16 and tile_vmem_bytes(TM) > tile_budget:
        TM = max(16, _round_up(TM // 2, 16))

    w_bytes = 2 * (K_pad * (2 * D_pad) * 2)        # stacked bf16 weight (double-buffer safe)
    vmem_limit = int(min(vmem_cap // 2,
                         max(24 << 20, tile_vmem_bytes(TM) * 1.3 + w_bytes + (2 << 20))))

    N_pad = _round_up(N, TM)
    if N_pad != N:
        slab = jnp.pad(slab, ((0, N_pad - N), (0, 0)))
    grid = (N_pad // TM,)

    row = lambda i: (i, 0)
    full = lambda i: (0, 0)
    kernel = partial(fused_embed_kernel, d_pad=D_pad, d_true=D, ln_eps=LN_EPS)

    out = pl.pallas_call(
        kernel,
        out_shape=jax.ShapeDtypeStruct((N_pad, D_pad), dtype),   # model dtype, lane-dense
        grid=grid,
        in_specs=[
            pl.BlockSpec((TM, K_pad), row),          # packed activation slab (bf16)
            pl.BlockSpec((K_pad, 2 * D_pad), full),  # block-diagonal stacked weight (bf16)
            pl.BlockSpec((1, D_pad), full),          # embed_dihedrals.norm gain (f32)
            pl.BlockSpec((1, D_pad), full),          # embed_dihedrals.norm bias (f32)
        ],
        out_specs=pl.BlockSpec((TM, D_pad), row),
        compiler_params=pltpu.CompilerParams(
            dimension_semantics=("parallel",),
            vmem_limit_bytes=vmem_limit),
    )(slab, w_stacked, ln_g, ln_b)

    return out[:N, :D].reshape(B, L, D)


# ---------------- deterministic parameter init -----------------------------------------
def init_params(key, D, S_h, V_h):
    ks = jax.random.split(key, 6)
    G = S_h + 3 * V_h

    def lin(k, fan_in, fan_out, scale=0.02):
        return jax.random.normal(k, (fan_in, fan_out), jnp.float32) * scale

    return {
        'w_feat': lin(ks[0], 15, D),                       # in = 6 + 3*3
        'b_feat': jnp.zeros((1, D), jnp.float32),
        'w_dih': lin(ks[1], 6, D),
        'b_dih': jnp.zeros((1, D), jnp.float32),
        'ln_g': jnp.ones((1, D), jnp.float32),
        'ln_b': jnp.zeros((1, D), jnp.float32),
        'w_gvp': lin(ks[2], G, D),                         # gvp_out_dim = S_h + 3*V_h
        'b_gvp': jnp.zeros((1, D), jnp.float32),
        'aatype_embedding': jax.random.normal(ks[3], (22, D), jnp.float32) * 0.02,
        # stand-in GVP encoder projections (see TODO(synk) above)
        'gvp_ws': jax.random.normal(ks[4], (6, S_h), jnp.float32) * 0.1,
        'gvp_wv': jax.random.normal(ks[5], (3, V_h), jnp.float32) * 0.1,
    }


if __name__ == "__main__":
    key = jax.random.PRNGKey(0)
    B, L, D = 2, 8, 32
    S_h, V_h = 16, 4                    # gvp.node_hidden_dim_scalar / _vector
    k1, k2, kp = jax.random.split(key, 3)

    batch = {
        'gt_backbone_pos': jax.random.normal(k1, (B, L, 4, 3), jnp.float32),   # N, CA, C, O
        'gt_backbone_frame': jax.random.normal(k2, (B, L, 4, 4), jnp.float32), # unused on this path
        'single_mask': jnp.ones((B, L), jnp.float32),
        'single_res_rel': jnp.tile(jnp.arange(L, dtype=jnp.int32)[None], (B, 1)),
        'aatype': jnp.zeros((B, L), jnp.int32),
    }
    condition_mask = jnp.ones((B, L), jnp.float32).at[1, -2:].set(0.0)

    params = init_params(kp, D, S_h, V_h)
    cfg = {'embed_dim': D, 'node_hidden_dim_scalar': S_h, 'node_hidden_dim_vector': V_h}

    out = gvp_structure_embedding(params, batch, condition_mask, cfg)
    jax.block_until_ready(out)
    assert out.shape == (B, L, D) and out.dtype == batch['gt_backbone_pos'].dtype
    assert bool(jnp.all(jnp.isfinite(out)))
    print("KERNEL_OK")
</pallas_src>

<mosaic_0001>
module attributes {stable_mosaic.version = 11 : i64} {
  func.func @fused_embed_kernel(%arg0: i32, %arg1: memref<16x64xbf16, #tpu.memory_space<vmem>>, %arg2: memref<64x256xbf16, #tpu.memory_space<vmem>>, %arg3: memref<1x128xf32, #tpu.memory_space<vmem>>, %arg4: memref<1x128xf32, #tpu.memory_space<vmem>>, %arg5: memref<16x128xf32, #tpu.memory_space<vmem>>) attributes {dimension_semantics = [#tpu.dimension_semantics<parallel>], iteration_bounds = array<i64: 1>, scalar_prefetch = 0 : i64, scratch_operands = 0 : i64, tpu.core_type = #tpu.core_type<tc>, window_params = [{transform_indices = @transform_0, window_bounds = array<i64: 16, 64>}, {pipeline_mode = #tpu.pipeline_mode<synchronous>, transform_indices = @transform_1, window_bounds = array<i64: 64, 256>}, {pipeline_mode = #tpu.pipeline_mode<synchronous>, transform_indices = @transform_2, window_bounds = array<i64: 1, 128>}, {pipeline_mode = #tpu.pipeline_mode<synchronous>, transform_indices = @transform_3, window_bounds = array<i64: 1, 128>}, {transform_indices = @transform_4, window_bounds = array<i64: 16, 128>}]} {
    %c0 = arith.constant 0 : index
    %c0_0 = arith.constant 0 : index
    %0 = vector.load %arg1[%c0, %c0_0] : memref<16x64xbf16, #tpu.memory_space<vmem>>, vector<16x64xbf16>
    %c0_1 = arith.constant 0 : index
    %c0_2 = arith.constant 0 : index
    %1 = vector.load %arg2[%c0_1, %c0_2] : memref<64x256xbf16, #tpu.memory_space<vmem>>, vector<64x256xbf16>
    %cst = arith.constant dense<0.000000e+00> : vector<16x256xf32>
    %2 = tpu.matmul %0, %1, %cst {dimension_numbers = #tpu.dot_dimension_numbers<[1], [0], [0], [1], [0, 0, 1, 1], [], []>} : vector<16x64xbf16>, vector<64x256xbf16>, vector<16x256xf32> -> vector<16x256xf32>
    %3 = vector.extract_strided_slice %2 {offsets = [0, 0], sizes = [16, 128], strides = [1, 1]} : vector<16x256xf32> to vector<16x128xf32>
    %4 = vector.extract_strided_slice %2 {offsets = [0, 128], sizes = [16, 128], strides = [1, 1]} : vector<16x256xf32> to vector<16x128xf32>
    %cst_3 = arith.constant dense<0.000000e+00> : vector<16xf32>
    %5 = vector.multi_reduction <add>, %4, %cst_3 [1] : vector<16x128xf32> to vector<16xf32>
    %6 = vector.shape_cast %5 : vector<16xf32> to vector<16x1xf32>
    %cst_4 = arith.constant 3.125000e-02 : f32
    %7 = vector.broadcast %cst_4 : f32 to vector<16x1xf32>
    %8 = arith.mulf %6, %7 : vector<16x1xf32>
    %9 = tpu.iota {dimensions = array<i32: 1>} : vector<16x128xi32>
    %c32_i32 = arith.constant 32 : i32
    %10 = vector.broadcast %c32_i32 : i32 to vector<16x128xi32>
    %11 = arith.cmpi slt, %9, %10 : vector<16x128xi32>
    %12 = vector.broadcast %8 : vector<16x1xf32> to vector<16x128xf32>
    %13 = arith.subf %4, %12 : vector<16x128xf32>
    %cst_5 = arith.constant 0.000000e+00 : f32
    %14 = vector.broadcast %cst_5 : f32 to vector<16x128xf32>
    %15 = arith.select %11, %13, %14 : vector<16x128xi1>, vector<16x128xf32>
    %16 = arith.mulf %15, %15 : vector<16x128xf32>
    %cst_6 = arith.constant dense<0.000000e+00> : vector<16xf32>
    %17 = vector.multi_reduction <add>, %16, %cst_6 [1] : vector<16x128xf32> to vector<16xf32>
    %18 = vector.shape_cast %17 : vector<16xf32> to vector<16x1xf32>
    %cst_7 = arith.constant 3.125000e-02 : f32
    %19 = vector.broadcast %cst_7 : f32 to vector<16x1xf32>
    %20 = arith.mulf %18, %19 : vector<16x1xf32>
    %21 = vector.broadcast %8 : vector<16x1xf32> to vector<16x128xf32>
    %22 = arith.subf %4, %21 : vector<16x128xf32>
    %cst_8 = arith.constant 9.99999974E-6 : f32
    %23 = vector.broadcast %cst_8 : f32 to vector<16x1xf32>
    %24 = arith.addf %20, %23 : vector<16x1xf32>
    %25 = math.rsqrt %24 : vector<16x1xf32>
    %26 = vector.broadcast %25 : vector<16x1xf32> to vector<16x128xf32>
    %27 = arith.mulf %22, %26 : vector<16x128xf32>
    %c0_9 = arith.constant 0 : index
    %c0_10 = arith.constant 0 : index
    %28 = vector.load %arg3[%c0_9, %c0_10] : memref<1x128xf32, #tpu.memory_space<vmem>>, vector<1x128xf32>
    %29 = vector.broadcast %28 : vector<1x128xf32> to vector<16x128xf32>
    %30 = arith.mulf %27, %29 : vector<16x128xf32>
    %c0_11 = arith.constant 0 : index
    %c0_12 = arith.constant 0 : index
    %31 = vector.load %arg4[%c0_11, %c0_12] : memref<1x128xf32, #tpu.memory_space<vmem>>, vector<1x128xf32>
    %32 = vector.broadcast %31 : vector<1x128xf32> to vector<16x128xf32>
    %33 = arith.addf %30, %32 : vector<16x128xf32>
    %34 = arith.addf %3, %33 : vector<16x128xf32>
    %c0_13 = arith.constant 0 : index
    %c0_14 = arith.constant 0 : index
    %35 = vector.load %arg5[%c0_13, %c0_14] : memref<16x128xf32, #tpu.memory_space<vmem>>, vector<16x128xf32>
    tpu.vector_store %arg5[%c0_13, %c0_14], %34 {strides = array<i32>} : memref<16x128xf32, #tpu.memory_space<vmem>>, vector<16x128xf32>,
    return
  }
  func.func @transform_0(%arg0: i32) -> (i32, i32) {
    %c0_i32 = arith.constant 0 : i32
    %c0_i32_0 = arith.constant 0 : i32
    return %arg0, %c0_i32 : i32, i32
  }
  func.func @transform_1(%arg0: i32) -> (i32, i32) {
    %c0_i32 = arith.constant 0 : i32
    %c0_i32_0 = arith.constant 0 : i32
    %c0_i32_1 = arith.constant 0 : i32
    return %c0_i32, %c0_i32_0 : i32, i32
  }
  func.func @transform_2(%arg0: i32) -> (i32, i32) {
    %c0_i32 = arith.constant 0 : i32
    %c0_i32_0 = arith.constant 0 : i32
    %c0_i32_1 = arith.constant 0 : i32
    return %c0_i32, %c0_i32_0 : i32, i32
  }
  func.func @transform_3(%arg0: i32) -> (i32, i32) {
    %c0_i32 = arith.constant 0 : i32
    %c0_i32_0 = arith.constant 0 : i32
    %c0_i32_1 = arith.constant 0 : i32
    return %c0_i32, %c0_i32_0 : i32, i32
  }
  func.func @transform_4(%arg0: i32) -> (i32, i32) {
    %c0_i32 = arith.constant 0 : i32
    %c0_i32_0 = arith.constant 0 : i32
    return %arg0, %c0_i32 : i32, i32
  }
}

</mosaic_0001>

<bundles_post_ra>
// kernel: tpu_custom_call.1
= control target key start
LH: loop header
LB: loop body
LE: loop exit
PB: predicated region body
PF: predicated region fallthrough
CT: control target
= control target key end

     0   :  { %9 = vsyncpa [#allocation3], 0  ;;  %s406_s0 = inlined_call_operand.hbm [shape: bf16[16,64], index: 0, kind: input, shape index: {}]   ;;  %s407_s1 = inlined_call_operand.hbm [shape: bf16[64,256], index: 1, kind: input, shape index: {}]   ;;  %s408_s2 = inlined_call_operand.vmem [shape: f32[1,128], index: 2, kind: input, shape index: {}]   ;;  %s409_s3 = inlined_call_operand.vmem [shape: f32[1,128], index: 3, kind: input, shape index: {}]   ;;  %s410_s4 = inlined_call_operand.hbm [shape: f32[16,128], index: 4, kind: output, shape index: {}]  }
   0x1   :  { %10 = vsyncpa [#allocation6], 0 }
   0x2   :  { %11 = vsyncpa [#allocation4], 0  ;;  %s325_s15 = smov [#allocation2]   ;;  %s253_s19 = scalar_lea.hbm %s406_s0, 128 }
   0x3   :  { %s17_s16 = sshll.u32 %s325_s15, 4  ;;  %p254_p0 = scmp.ne.s32.totalorder %s406_s0, %s253_s19  ;;  %s18_s16 = int_to_ptr.vmem [resolvable:$true] %s17_s16 }
   0x4   :  { %p257_p1 = scmp.lt.u32.totalorder %s253_s19, %s406_s0 }
   0x6   :  { %p259_p2 = pnand %p257_p1, %p254_p0 }
   0x8   :  { %262 = shalt.err (!%p259_p2)
}
   0x9   :  { %s263_s24 = scalar_lea.vmem %s18_s16, 128  ;;  %p268_p4 = scmp.lt.s32.totalorder %s18_s16, %s18_s16 }
   0xa   :  { %p264_p3 = scmp.ne.s32.totalorder %s18_s16, %s263_s24  ;;  %p269_p5 = scmp.lt.s32.totalorder %s263_s24, %s263_s24 }
   0xc   :  { %p270_p6 = por %p269_p5, %p268_p4 }
   0xe   :  { %p271_p7 = pnand %p270_p6, %p264_p3 }
  0x10   :  { %274 = shalt.err (!%p271_p7)
}
  0x11   :  { %s326_s25 = smov 64   ;;  %s327_s26 = smov 4  }
  0x12   :  { %23 = dma.hbm_to_vmem [thread:$0]  %s406_s0, 128, %s18_s16, [#allocation3], %s326_s25, %s326_s25, %s327_s26  }
  0x13   :  { %s328_s29 = smov [#allocation5]   ;;  %s275_s7 = scalar_lea.hbm %s407_s1, 1024 }
  0x14   :  { %s29_s30 = sshll.u32 %s328_s29, 4  ;;  %p276_p8 = scmp.ne.s32.totalorder %s407_s1, %s275_s7  ;;  %s30_s30 = int_to_ptr.vmem [resolvable:$true] %s29_s30 }
  0x15   :  { %p279_p9 = scmp.lt.u32.totalorder %s275_s7, %s407_s1 }
  0x17   :  { %p281_p10 = pnand %p279_p9, %p276_p8 }
  0x19   :  { %284 = shalt.err (!%p281_p10)
}
  0x1a   :  { %s285_s12 = scalar_lea.vmem %s30_s30, 1024  ;;  %p290_p12 = scmp.lt.s32.totalorder %s30_s30, %s30_s30 }
  0x1b   :  { %p286_p11 = scmp.ne.s32.totalorder %s30_s30, %s285_s12  ;;  %p291_p13 = scmp.lt.s32.totalorder %s285_s12, %s285_s12 }
  0x1d   :  { %p292_p0 = por %p291_p13, %p290_p12 }
  0x1f   :  { %p293_p1 = pnand %p292_p0, %p286_p11 }
  0x21   :  { %296 = shalt.err (!%p293_p1)
}
  0x22   :  { %s329_s0 = smov 128   ;;  %s330_s13 = smov 8  }
  0x23   :  { %35 = dma.hbm_to_vmem [thread:$0]  %s407_s1, 1024, %s30_s30, [#allocation6], %s329_s0, %s329_s0, %s330_s13  }
  0x24   :  { %319 = dma.done.wait [#allocation3], 128  }
  0x25   :  { %320 = vsyncadd [#allocation3], 4294967168 }
  0x26   :  { %321 = dma.done.wait [#allocation6], 1024  }
  0x27   :  { %322 = vsyncadd [#allocation6], 4294966272  ;;  %v331_v0 = vmov 0   ;;  %v236_v1 = vld [vmem:[#allocation5 + $0x4] ss:$8 sps:$4 sm:$0xff]   ;;  %v248_v9 = vld [vmem:[#allocation2] sm:$0xff]   ;;  %v155_v14 = vlaneseq }
  0x28   :  { %138 = vmatprep.mubr.bf16.mxu0 %v331_v0  ;;  %v238_v2 = vld [vmem:[#allocation5] ss:$8 sps:$4 sm:$0xff]   ;;  %106 = vmatprep.subr.bf16.mxu0 %v236_v1  ;;  %v239_v3 = vld [vmem:[#allocation5 + $0x14] ss:$8 sps:$4 sm:$0xff]   ;;  %v241_v4 = vld [vmem:[#allocation5 + $0x10] ss:$8 sps:$4 sm:$0xff]  }
  0x29   :  { %107 = vmatpush1.bf16.msra.mxu0 %v238_v2  ;;  %v242_v5 = vld [vmem:[#allocation5 + $0x24] ss:$8 sps:$4 sm:$0xff]   ;;  %v244_v6 = vld [vmem:[#allocation5 + $0x20] ss:$8 sps:$4 sm:$0xff]   ;;  %v245_v7 = vld [vmem:[#allocation5 + $0x34] ss:$8 sps:$4 sm:$0xff]  }
  0x2a   :  { %108 = vmatprep.subr.bf16.mxu0 %v239_v3  ;;  %v247_v8 = vld [vmem:[#allocation5 + $0x30] ss:$8 sps:$4 sm:$0xff]   ;;  %vm102_vm0 = vcmask 523264   ;;  %v156_v15 = vand.u32 127, %v155_v14  ;;  %s332_s19 = smov [#allocation7]  }
  0x2b   :  { %v226_v33 = vld [vmem:[%s408_s2] ss:$0 sm:$0xff]  ;;  %s203_s20 = sshll.u32 %s332_s19, 4  ;;  %s204_s20 = int_to_ptr.vmem [resolvable:$true] %s203_s20 }
  0x2c   :  { %vm157_vm1 = vcmp.lt.s32.totalorder %v156_v15, 32  ;;  %v227_v35 = vld [vmem:[%s409_s3] ss:$0 sm:$0xff]  ;;  %s297_s21 = scalar_lea.vmem %s204_s20, 256  ;;  %p302_p3 = scmp.lt.s32.totalorder %s204_s20, %s204_s20 }
  0x2d   :  { %109 = vmatpush1.bf16.msra.mxu0 %v241_v4  ;;  %p298_p2 = scmp.ne.s32.totalorder %s204_s20, %s297_s21  ;;  %p303_p4 = scmp.lt.s32.totalorder %s297_s21, %s297_s21 }
  0x2e   :  { %110 = vmatprep.subr.bf16.mxu0 %v242_v5 }
  0x2f   :  { %p304_p5 = por %p303_p4, %p302_p3 }
  0x31   :  { %111 = vmatpush1.bf16.msra.mxu0 %v244_v6  ;;  %p305_p6 = pnand %p304_p5, %p298_p2 }
  0x32   :  { %112 = vmatprep.subr.bf16.mxu0 %v245_v7 }
  0x35   :  { %113 = vmatpush1.bf16.msra.mxu0 %v247_v8 }
  0x38   :  { %225 = vmatmul.mubr.msk.bf16.vlgmr.msra.gmra.mrb[0].mxu0 %vm102_vm0, %v248_v9 }
 0x10b   :  { %v140_v10 = vpop.f32.mrb[0].mxu0 }
 0x10c   :  { %v142_v11 = vpop.f32.mrb[1].mxu0 }
 0x10d   :  { %149 = vadd.xlane.f32.xlu0 %v142_v11  ;;  %v144_v12 = vpop.f32.mrb[2].mxu0 }
 0x10e   :  { %v146_v13 = vpop.f32.mrb[3].mxu0 }
 0x111   :  { %151 = vadd.xlane.f32.xlu0 %v146_v13 }
 0x19a   :  { %v150_v16 = vpop.xlane.xlu0 %149 }
 0x19b   :  { %v153_v17 = vmul.f32 0.03125, %v150_v16 }
 0x19d   :  { %v158_v18 = vsub.f32 %v142_v11, %v153_v17 }
 0x19e   :  { %v152_v19 = vpop.xlane.xlu0 %151 }
 0x19f   :  { %v154_v20 = vmul.f32 0.03125, %v152_v19  ;;  %v160_v21 = vsel %vm157_vm1, %v158_v18, 0.0 }
 0x1a0   :  { %v162_v22 = vmul.f32 %v160_v21, %v160_v21 }
 0x1a1   :  { %v159_v23 = vsub.f32 %v146_v13, %v154_v20 }
 0x1a2   :  { %164 = vadd.xlane.f32.xlu1 %v162_v22 }
 0x1a3   :  { %v161_v24 = vsel %vm157_vm1, %v159_v23, 0.0 }
 0x1a4   :  { %v163_v25 = vmul.f32 %v161_v24, %v161_v24 }
 0x1a6   :  { %166 = vadd.xlane.f32.xlu1 %v163_v25 }
 0x22f   :  { %v165_v26 = vpop.xlane.xlu1 %164 }
 0x230   :  { %v168_v27 = vmul.f32 0.03125, %v165_v26 }
 0x232   :  { %v170_v28 = vadd.f32 1e-05, %v168_v27 }
 0x233   :  { %v167_v29 = vpop.xlane.xlu1 %166 }
 0x234   :  { %249 = vrsqrt.f32 %v170_v28  ;;  %v169_v30 = vmul.f32 0.03125, %v167_v29 }
 0x236   :  { %v171_v31 = vadd.f32 1e-05, %v169_v30 }
 0x238   :  { %251 = vrsqrt.f32 %v171_v31 }
 0x23e   :  { %v250_v32 = vpop.eup %249 }
 0x23f   :  { %v174_v34 = vmul.f32 %v250_v32, %v158_v18 }
 0x241   :  { %v183_v36 = vmul.f32 %v226_v33, %v174_v34 }
 0x242   :  { %v252_v37 = vpop.eup %251 }
 0x243   :  { %v175_v38 = vmul.f32 %v252_v37, %v159_v23  ;;  %v192_v39 = vadd.f32 %v227_v35, %v183_v36 }
 0x245   :  { %v184_v40 = vmul.f32 %v226_v33, %v175_v38  ;;  %v194_v41 = vadd.f32 %v192_v39, %v140_v10 }
 0x247   :  { %v193_v42 = vadd.f32 %v227_v35, %v184_v40  ;;  %196 = vst [vmem:[#allocation7] sm:$0xff] %v194_v41 }
 0x249   :  { %v195_v43 = vadd.f32 %v193_v42, %v144_v12 }
 0x24b   :  { %197 = vst [vmem:[#allocation7 + $0x8] sm:$0xff] %v195_v43 }
 0x24c   :  { %308 = shalt.err (!%p305_p6)
}
 0x24d   :  { %s309_s22 = scalar_lea.hbm %s410_s4, 256 }
 0x24e   :  { %p310_p7 = scmp.ne.s32.totalorder %s410_s4, %s309_s22  ;;  %p313_p8 = scmp.lt.u32.totalorder %s309_s22, %s410_s4 }
 0x250   :  { %p315_p9 = pnand %p313_p8, %p310_p7 }
 0x252   :  { %318 = shalt.err (!%p315_p9)
}
 0x253   :  { %209 = dma.vmem_to_hbm [thread:$0]  %s204_s20, 256, %s410_s4, [#allocation4], %s329_s0, %s329_s0, %s330_s13  }
 0x254   :  { %323 = dma.done.wait [#allocation4], 256  }
 0x255   :  { %324 = vsyncadd [#allocation4], 4294967040 }
 0x256   :  { %213 = vsyncpa [#allocation3], 1 }
 0x257   :  { %214 = vsyncpa [#allocation6], 1 }
 0x258   :  { %215 = vsyncpa [#allocation4], 1 }

</bundles_post_ra>
